<compile_context>
chip_gen: v7x
topology: tpu7x:2x2x1
jax: 0.10.0
libtpu: 0.0.40
codegen_flags: <defaults>
</compile_context>

<pallas_src>
import jax
import jax.numpy as jnp
from jax.experimental import pallas as pl
from jax.experimental.pallas import tpu as pltpu


def _transconv_kernel(x_ref, w_ref, b_ref, o_ref):
    # Hot path: (t_co, C_in) @ (C_in, t_hw) on the MXU, bias add fused on the VPU.
    x = x_ref[0]                                                    # (C_in, t_hw)
    acc = jnp.dot(w_ref[...], x, preferred_element_type=jnp.float32)  # (t_co, t_hw)
    o_ref[0] = (acc + b_ref[...]).astype(o_ref.dtype)


def _vmem_limit_bytes():
    # Derive the scoped-VMEM request from physical VMEM (v5e/v6e: 128 MiB, v7x: 64 MiB),
    # leaving headroom for Mosaic internal scratch. Never ask for more than 64 MiB.
    try:
        cap = pltpu.get_tpu_info().vmem_capacity_bytes
    except Exception:
        cap = 64 * 1024 * 1024
    return int(min(cap * 3 // 4, 64 * 1024 * 1024))


def _pick_tiles(hw, c_in, n_out, in_bytes, tile_budget_bytes):
    # Tile over the (4*C_out) rows only when the weight block would otherwise dominate VMEM.
    t_co = n_out
    if n_out > 1024:
        for cand in (1024, 512, 256, 128):
            if n_out % cand == 0:
                t_co = cand
                break
    w_bytes = t_co * c_in * in_bytes                    # resident weight block
    avail = max(tile_budget_bytes - 2 * w_bytes, 1 << 20)
    # per output lane (double buffered): one x column + one f32 output column
    per_lane = 2 * (c_in * in_bytes + t_co * 4)
    t_hw = int((avail // per_lane) // 128 * 128)
    t_hw = max(128, min(t_hw, 2048))
    if hw <= t_hw:
        t_hw = hw                                       # full extent (any size is legal)
    return t_co, t_hw


def up_conv_fusion_forward(x_nchw, weight, bias, *, compute_dtype=jnp.float32):
    """ConvTranspose2d(ch_in, ch_out, kernel_size=2, stride=2) forward.

    x_nchw : (N, C_in, H, W)
    weight : (C_in, C_out, 2, 2) float32   (PyTorch ConvTranspose2d layout)
    bias   : (C_out,) float32
    returns: (N, C_out, 2H, 2W) float32
    """
    N, C_in, H, W = x_nchw.shape
    C_out = weight.shape[1]
    HW = H * W
    n_out = 4 * C_out
    in_bytes = jnp.dtype(compute_dtype).itemsize

    # Free reshape for the activation (no NCHW->NHWC transpose); tiny parameter shuffles only.
    x_flat = x_nchw.reshape(N, C_in, HW).astype(compute_dtype)
    w_t = jnp.transpose(weight.reshape(C_in, n_out)).astype(compute_dtype)   # (4*C_out, C_in)
    b_col = jnp.repeat(bias.astype(jnp.float32), 4).reshape(n_out, 1)        # (4*C_out, 1)

    vmem_limit = _vmem_limit_bytes()
    t_co, t_hw = _pick_tiles(HW, C_in, n_out, in_bytes,
                             tile_budget_bytes=vmem_limit * 3 // 4)

    co_blocks = pl.cdiv(n_out, t_co)
    hw_blocks = pl.cdiv(HW, t_hw)
    grid = (N, co_blocks, hw_blocks)

    if co_blocks == 1:
        # Weight / bias blocks are grid-invariant: single-buffer them so the freed VMEM
        # buys a larger spatial tile.
        w_spec = pl.BlockSpec((t_co, C_in), lambda n, c, j: (0, 0),
                              pipeline_mode=pl.Buffered(1))
        b_spec = pl.BlockSpec((t_co, 1), lambda n, c, j: (0, 0),
                              pipeline_mode=pl.Buffered(1))
    else:
        w_spec = pl.BlockSpec((t_co, C_in), lambda n, c, j: (c, 0))
        b_spec = pl.BlockSpec((t_co, 1), lambda n, c, j: (c, 0))

    y = pl.pallas_call(
        _transconv_kernel,
        out_shape=jax.ShapeDtypeStruct((N, n_out, HW), jnp.float32),
        grid_spec=pltpu.PrefetchScalarGridSpec(
            num_scalar_prefetch=0,
            grid=grid,
            in_specs=[
                pl.BlockSpec((1, C_in, t_hw), lambda n, c, j: (n, 0, j)),
                w_spec,
                b_spec,
            ],
            out_specs=pl.BlockSpec((1, t_co, t_hw), lambda n, c, j: (n, c, j)),
        ),
        compiler_params=pltpu.CompilerParams(
            dimension_semantics=("parallel", "parallel", "parallel"),
            vmem_limit_bytes=vmem_limit,
        ),
    )(x_flat, w_t, b_col)

    # (N, C_out*2*2, H*W) -> (N, C_out, 2, 2, H, W) -> (N, C_out, H, 2, W, 2) -> (N, C_out, 2H, 2W)
    # This is the single remaining full-tensor layout pass.
    y = y.reshape(N, C_out, 2, 2, H, W)
    y = jnp.transpose(y, (0, 1, 4, 2, 5, 3)).reshape(N, C_out, 2 * H, 2 * W)
    return y


def _reference_forward(x_nchw, weight, bias):
    # Pure-JAX reference of ConvTranspose2d(k=2, s=2) for verification.
    N, C_in, H, W = x_nchw.shape
    C_out = weight.shape[1]
    # out[n, co, 2i+ki, 2j+kj] = sum_ci x[n, ci, i, j] * W[ci, co, ki, kj] + b[co]
    y = jnp.einsum("ncij,codk->noidjk", x_nchw, weight)  # (N, C_out, H, 2, W, 2)
    y = y.reshape(N, C_out, 2 * H, 2 * W)
    return y + bias[None, :, None, None]


if __name__ == "__main__":
    key = jax.random.PRNGKey(0)
    k_x, k_w, k_b = jax.random.split(key, 3)

    N, C_in, C_out, H, W = 2, 4, 8, 16, 16
    x = jax.random.normal(k_x, (N, C_in, H, W), dtype=jnp.float32)
    # Deterministic synthetic parameters (same shapes as nn.ConvTranspose2d(ch_in, ch_out, 2, 2)).
    weight = jax.random.normal(k_w, (C_in, C_out, 2, 2), dtype=jnp.float32) * 0.1
    bias = jax.random.normal(k_b, (C_out,), dtype=jnp.float32) * 0.1

    ref = jax.block_until_ready(_reference_forward(x, weight, bias))

    # f32 operand path (exact)
    out = jax.block_until_ready(up_conv_fusion_forward(x, weight, bias))
    assert out.shape == (N, C_out, 2 * H, 2 * W)
    assert jnp.allclose(out, ref, atol=1e-5, rtol=1e-5), "f32 path mismatch vs reference"

    # bf16 operand path (f32 accumulation) — the recommended v6e/v7x configuration.
    out_bf16 = jax.block_until_ready(
        up_conv_fusion_forward(x, weight, bias, compute_dtype=jnp.bfloat16))
    assert jnp.allclose(out_bf16, ref, atol=3e-2, rtol=3e-2), "bf16 path mismatch vs reference"

    print("KERNEL_OK")
</pallas_src>

<mosaic_0001>
module attributes {stable_mosaic.version = 11 : i64} {
  func.func @_transconv_kernel(%arg0: i32, %arg1: i32, %arg2: i32, %arg3: memref<1x4x256xf32, #tpu.memory_space<vmem>>, %arg4: memref<32x4xf32, #tpu.memory_space<vmem>>, %arg5: memref<32x1xf32, #tpu.memory_space<vmem>>, %arg6: memref<1x32x256xf32, #tpu.memory_space<vmem>>) attributes {dimension_semantics = [#tpu.dimension_semantics<parallel>, #tpu.dimension_semantics<parallel>, #tpu.dimension_semantics<parallel>], iteration_bounds = array<i64: 2, 1, 1>, scalar_prefetch = 0 : i64, scratch_operands = 0 : i64, tpu.core_type = #tpu.core_type<tc>, window_params = [{transform_indices = @transform_0, window_bounds = array<i64: 1, 4, 256>}, {pipeline_mode = #tpu.pipeline_mode<synchronous>, transform_indices = @transform_1, window_bounds = array<i64: 32, 4>}, {pipeline_mode = #tpu.pipeline_mode<synchronous>, transform_indices = @transform_2, window_bounds = array<i64: 32, 1>}, {transform_indices = @transform_3, window_bounds = array<i64: 1, 32, 256>}]} {
    %c0 = arith.constant 0 : index
    %c0_0 = arith.constant 0 : index
    %c0_1 = arith.constant 0 : index
    %0 = vector.load %arg3[%c0, %c0_0, %c0_1] : memref<1x4x256xf32, #tpu.memory_space<vmem>>, vector<1x4x256xf32>
    %1 = vector.shape_cast %0 : vector<1x4x256xf32> to vector<4x256xf32>
    %c0_2 = arith.constant 0 : index
    %c0_3 = arith.constant 0 : index
    %2 = vector.load %arg4[%c0_2, %c0_3] : memref<32x4xf32, #tpu.memory_space<vmem>>, vector<32x4xf32>
    %cst = arith.constant dense<0.000000e+00> : vector<32x256xf32>
    %3 = tpu.matmul %2, %1, %cst {dimension_numbers = #tpu.dot_dimension_numbers<[1], [0], [0], [1], [0, 0, 1, 1], [], []>} : vector<32x4xf32>, vector<4x256xf32>, vector<32x256xf32> -> vector<32x256xf32>
    %c0_4 = arith.constant 0 : index
    %c0_5 = arith.constant 0 : index
    %4 = vector.load %arg5[%c0_4, %c0_5] : memref<32x1xf32, #tpu.memory_space<vmem>>, vector<32x1xf32>
    %5 = vector.broadcast %4 : vector<32x1xf32> to vector<32x256xf32>
    %6 = arith.addf %3, %5 : vector<32x256xf32>
    %c0_6 = arith.constant 0 : index
    %c0_7 = arith.constant 0 : index
    %c0_8 = arith.constant 0 : index
    %7 = vector.load %arg6[%c0_6, %c0_7, %c0_8] : memref<1x32x256xf32, #tpu.memory_space<vmem>>, vector<1x32x256xf32>
    %8 = vector.shape_cast %7 : vector<1x32x256xf32> to vector<32x256xf32>
    %9 = vector.shape_cast %6 : vector<32x256xf32> to vector<1x32x256xf32>
    tpu.vector_store %arg6[%c0_6, %c0_7, %c0_8], %9 {strides = array<i32>} : memref<1x32x256xf32, #tpu.memory_space<vmem>>, vector<1x32x256xf32>,
    return
  }
  func.func @transform_0(%arg0: i32, %arg1: i32, %arg2: i32) -> (i32, i32, i32) {
    %c0_i32 = arith.constant 0 : i32
    %c0_i32_0 = arith.constant 0 : i32
    return %arg0, %c0_i32, %arg2 : i32, i32, i32
  }
  func.func @transform_1(%arg0: i32, %arg1: i32, %arg2: i32) -> (i32, i32) {
    %c0_i32 = arith.constant 0 : i32
    %c0_i32_0 = arith.constant 0 : i32
    %c0_i32_1 = arith.constant 0 : i32
    return %c0_i32, %c0_i32_0 : i32, i32
  }
  func.func @transform_2(%arg0: i32, %arg1: i32, %arg2: i32) -> (i32, i32) {
    %c0_i32 = arith.constant 0 : i32
    %c0_i32_0 = arith.constant 0 : i32
    %c0_i32_1 = arith.constant 0 : i32
    return %c0_i32, %c0_i32_0 : i32, i32
  }
  func.func @transform_3(%arg0: i32, %arg1: i32, %arg2: i32) -> (i32, i32, i32) {
    %c0_i32 = arith.constant 0 : i32
    return %arg0, %arg1, %arg2 : i32, i32, i32
  }
}

</mosaic_0001>

<bundles_post_ra>
// kernel: tpu_custom_call.1
= control target key start
LH: loop header
LB: loop body
LE: loop exit
PB: predicated region body
PF: predicated region fallthrough
CT: control target
= control target key end

     0   :  { %8 = vsyncpa [#allocation3], 0  ;;  %s792_s0 = inlined_call_operand.vmem [shape: f32[2,4,256], index: 0, kind: input, shape index: {}]   ;;  %s793_s1 = inlined_call_operand.vmem [shape: f32[32,4], index: 1, kind: input, shape index: {}]   ;;  %s794_s2 = inlined_call_operand.vmem [shape: f32[32,1], index: 2, kind: input, shape index: {}]   ;;  %s795_s3 = inlined_call_operand.hbm [shape: f32[2,32,256], index: 3, kind: output, shape index: {}]  }
   0x1   :  { %10 = vsyncpa [#allocation3 + $0x1], 0  ;;  %s649_s12 = smov 0   ;;  %s651_s13 = smov 0  }
   0x2   :  { %s653_s14 = smov 0   ;;  %s655_s15 = smov 0  }
   0x3   :  { %s657_s16 = smov 0   ;;  %s659_s17 = smov 0  }
   0x4 LB: > { %s459_s18 = sadd.s32 4294967295, %s622_s17   ;;  %s460_s19 = sadd.s32 4294967294, %s622_s17   ;;  %s622_s17 = sphi %s659_s17, %s16_s17   ;;  %s618_s16 = sphi %s657_s16, %s802_s16   ;;  %s614_s15 = sphi %s655_s15, %s801_s15   ;;  %s610_s14 = sphi %s653_s14, %s800_s14   ;;  %s606_s13 = sphi %s651_s13, %s799_s13   ;;  %s602_s12 = sphi %s649_s12, %s798_s12  }
   0x5   : > { %s35_s20 = sadd.s32 1, %s618_s16  ;;  %s116_s21 = sadd.s32 1, %s610_s14 }
   0x6   : > { %p37_p0 = scmp.ge.s32.totalorder %s35_s20, 2  ;;  %p126_p1 = scmp.ne.s32.totalorder %s610_s14, %s606_s13 }
   0x7   : > { %p127_p2 = scmp.eq.s32.totalorder %s459_s18, 1  ;;  %p132_p3 = scmp.ne.s32.totalorder %s606_s13, %s602_s12 }
   0x8   : > { %s804_s20 = smov (%p37_p0, %s35_s20), 0  ;;  %p133_p5 = scmp.eq.s32.totalorder %s460_s19, 1 }
   0x9   : > { %p689_p4 = por %p127_p2, %p126_p1  ;;  %s109_s23 = ssub.s32 %s618_s16, %s804_s20 }
   0xa   : > { %p463_p6 = scmp.ge.s32.totalorder %s622_s17, 1  ;;  %p114_p7 = scmp.eq.s32.totalorder %s109_s23, 0 }
   0xb   : > { %p696_p8 = por %p133_p5, %p132_p3  ;;  %p170_p9 = scmp.lt.s32.totalorder %s622_s17, 3 }
   0xc   : > { %s702_s25 = scalar_select %p114_p7, %s610_s14, %s116_s21  }
   0xd   : > { %p171_p10 = pnand %p463_p6, %p170_p9 }
   0xe   : > { %p199_p11 = scmp.lt.s32.totalorder (!%p171_p10), %s614_s15, 1  ;;  %v624_v0 = vmov (!%p171_p10), 0.0   ;;  %v217_v1 = vld [vmem:[%s794_s2 + $0x10] sm:$0xff] (!%p171_p10)  ;;  %v625_v2 = vmov (!%p171_p10), 0   ;;  %v215_v3 = vld [vmem:[%s794_s2] sm:$0xff] (!%p171_p10)  ;;  %v218_v4 = vld [vmem:[%s794_s2 + $0x18] sm:$0xff] (!%p171_p10) }
   0xf   : > { %174 = sbr.rel (%p171_p10) target bundleno = 265 (0x109), region = 32  ;;  %323 = vmatprep.mubr.f32.mxu0 (!%p171_p10), %v624_v0  ;;  %335 = vmatprep.mubr.f32.mxu1 (!%p171_p10), %v624_v0  ;;  %v216_v5 = vld [vmem:[%s794_s2 + $0x8] sm:$0xff] (!%p171_p10)  ;;  %vm254_vm0 = vcmask (!%p171_p10), 1043456   ;;  %v211_v8 = vld [vmem:[%s793_s1] sm:$0xff] (!%p171_p10)  ;;  %vm241_vm1 = vcmask (!%p171_p10), 31744   ;;  %v213_v9 = vld [vmem:[%s793_s1 + $0x10] sm:$0xff] (!%p171_p10) }
  0x10   : > { %542 = vset.pattern.permute.xlu1 (!%p171_p10), %v625_v2  ;;  %541 = vset.pattern.permute.xlu0 (!%p171_p10), %v625_v2  ;;  %v212_v10 = vld [vmem:[%s793_s1 + $0x8] sm:$0xff] (!%p171_p10)  ;;  %v214_v11 = vld [vmem:[%s793_s1 + $0x18] sm:$0xff] (!%p171_p10)  ;;  %s195_s30 = sand.u32 (!%p171_p10), 1, %s606_s13   ;;  %s479_s5 = sshll.u32 (!%p171_p10), %s614_s15, 10 }
  0x11   : > { %231 = vperm.xlu1 (!%p171_p10), %542, %v217_v1   ;;  %221 = vperm.xlu0 (!%p171_p10), %541, %v215_v3   ;;  %s746_s10 = scalar_lea.sflag (!%p171_p10), [#allocation3], %s195_s30  ;;  %s626_s18 = smov (!%p171_p10), [#allocation2]  }
  0x12   : > { %s548_s19 = sshll.u32 (!%p171_p10), %s626_s18, 4  ;;  %s549_s19 = int_to_ptr.vmem [resolvable:$false] %s548_s19 }
  0x13   : > { %s550_s21 = scalar_lea.vmem (!%p171_p10), %s549_s19, 2048 }
  0x15   : > { %236 = vperm.xlu1 (!%p171_p10), %542, %v218_v4   ;;  %226 = vperm.xlu0 (!%p171_p10), %541, %v216_v5  }
  0x16   : > { %s200_s28 = scalar_select %p199_p11, %s614_s15, 1 }
  0x17   : > { %s740_s15 = scalar_lea.hbm %s795_s3, %s479_s5 }
  0x18   : > { %s478_s4 = sshll.u32 %s200_s28, 3 }
  0x19   : > { %s206_s11 = scalar_lea.vmem %s792_s0, %s478_s4  ;;  %s464_s4 = sshll.u32 %s195_s30, 6 }
  0x1a   : > { %v210_v6 = vld [vmem:[%s206_s11] sm:$0xff]  ;;  %s197_s6 = scalar_lea.vmem [#allocation2], %s464_s4 }
  0x1b   : > { %v240_v7 = vcombine.high %v210_v6, %v210_v6  ;;  %s375_s7 = sshll.u32 %s197_s6, 4  ;;  %s742_s7 = int_to_ptr.vmem [resolvable:$true] %s375_s7 }
  0x1c   : > { %s544_s11 = scalar_lea.vmem %s742_s7, 1024  ;;  %p551_p1 = scmp.lt.s32.totalorder %s742_s7, %s549_s19 }
  0x1d   : > { %467 = vmatprep.subr.msk.mxu0 %vm254_vm0, %v240_v7  ;;  %480 = vmatprep.subr.msk.mxu1 %vm254_vm0, %v240_v7  ;;  %p545_p12 = scmp.ne.s32.totalorder %s742_s7, %s544_s11  ;;  %p552_p2 = scmp.lt.s32.totalorder %s550_s21, %s544_s11 }
  0x1e   : > { %468 = vmatpush1.msk.msra.mxu0 %vm254_vm0, %v210_v6  ;;  %481 = vmatpush1.msk.msra.mxu1 %vm254_vm0, %v210_v6 }
  0x1f   : > { %469 = vmatmul.mubr.msk.f32.vlgmr.msra.gmra.mrb[0].mxu0 %vm241_vm1, %v211_v8  ;;  %471 = vmatmul.mubr.msk.f32.vlgmr.msra.gmra.mrb[0].mxu1 %vm241_vm1, %v213_v9  ;;  %p546_p13 = pnand %p545_p12, %p689_p4  ;;  %p553_p3 = por %p552_p2, %p551_p1 }
  0x20   : > { %329 = vmatprep.mubr.f32.mxu0 %v624_v0  ;;  %341 = vmatprep.mubr.f32.mxu1 %v624_v0 }
  0x21   : > { %p547_p0 = pneg %p546_p13 }
  0x23   : > { %470 = vmatmul.mubr.msk.f32.gmra.mrb[2].mxu0 %vm241_vm1, %v212_v10  ;;  %472 = vmatmul.mubr.msk.f32.gmra.mrb[2].mxu1 %vm241_vm1, %v214_v11  ;;  %p554_p5 = pnand %p553_p3, %p547_p0 }
  0x90   : > { %v232_v12 = vpop.permute.xlu1 %231  ;;  %v222_v13 = vpop.permute.xlu0 %221 }
  0x94   : > { %v237_v22 = vpop.permute.xlu1 %236  ;;  %v227_v23 = vpop.permute.xlu0 %226 }
  0xf2   : > { %v325_v14 = vpop.f32.mrb[0].mxu0  ;;  %v337_v15 = vpop.f32.mrb[0].mxu1 }
  0xf3   : > { %v326_v16 = vadd.f32 %v325_v14, %v222_v13  ;;  %v338_v17 = vadd.f32 %v337_v15, %v232_v12  ;;  %v327_v18 = vpop.f32.mrb[1].mxu0  ;;  %v339_v19 = vpop.f32.mrb[1].mxu1 }
  0xf4   : > { %v328_v20 = vadd.f32 %v327_v18, %v222_v13  ;;  %v340_v21 = vadd.f32 %v339_v19, %v232_v12 }
  0xf5   : > { %348 = vst [vmem:[%s197_s6] sm:$0xff] %v326_v16  ;;  %352 = vst [vmem:[%s197_s6 + $0x20] sm:$0xff] %v338_v17 }
  0xf6   : > { %349 = vst [vmem:[%s197_s6 + $0x8] sm:$0xff] %v328_v20  ;;  %353 = vst [vmem:[%s197_s6 + $0x28] sm:$0xff] %v340_v21  ;;  %v331_v24 = vpop.f32.mrb[2].mxu0  ;;  %v343_v25 = vpop.f32.mrb[2].mxu1 }
  0xf7   : > { %v332_v26 = vadd.f32 %v331_v24, %v227_v23  ;;  %v344_v27 = vadd.f32 %v343_v25, %v237_v22  ;;  %v333_v28 = vpop.f32.mrb[3].mxu0  ;;  %v345_v29 = vpop.f32.mrb[3].mxu1 }
  0xf8   : > { %v334_v30 = vadd.f32 %v333_v28, %v227_v23  ;;  %v346_v31 = vadd.f32 %v345_v29, %v237_v22 }
  0xf9   : > { %350 = vst [vmem:[%s197_s6 + $0x10] sm:$0xff] %v332_v26  ;;  %354 = vst [vmem:[%s197_s6 + $0x30] sm:$0xff] %v344_v27 }
  0xfa   : > { %351 = vst [vmem:[%s197_s6 + $0x18] sm:$0xff] %v334_v30  ;;  %355 = vst [vmem:[%s197_s6 + $0x38] sm:$0xff] %v346_v31 }
  0xfb   : > { %557 = shalt.err (!%p554_p5)
}
  0xfc   : > { %s558_s23 = scalar_lea.hbm %s740_s15, 1024  ;;  %s562_s28 = scalar_lea.hbm %s795_s3, 2048 }
  0xfd   : > { %p559_p6 = scmp.ne.s32.totalorder %s740_s15, %s558_s23  ;;  %p563_p10 = scmp.lt.u32.totalorder %s740_s15, %s795_s3 }
  0xfe   : > { %p564_p11 = scmp.lt.u32.totalorder %s562_s28, %s558_s23  ;;  %p566_p13 = scmp.lt.u32.totalorder %s558_s23, %s740_s15 }
  0xff   : > { %p560_p7 = pnand %p559_p6, %p689_p4 }
 0x100   : > { %p565_p12 = por %p564_p11, %p563_p10 }
 0x101   : > { %p561_p9 = pneg %p560_p7 }
 0x102   : > { %p567_p0 = por %p566_p13, %p565_p12 }
 0x104   : > { %p568_p1 = pnand %p567_p0, %p561_p9 }
 0x106   : > { %571 = shalt.err (!%p568_p1)
}
 0x107   : > { %s627_s4 = smov 256   ;;  %s628_s5 = smov 16  }
 0x108   : > { %482 = dma.vmem_to_hbm [thread:$0]  (%p689_p4), %s742_s7, 1024, %s740_s15, %s746_s10, %s627_s4, %s627_s4, %s628_s5  }
 0x109 PF: > { %p488_p2 = scmp.ge.s32.totalorder %s622_s17, 2  ;;  %s390_s6 = sand.u32 1, %s602_s12  }
 0x10a   : > { %s391_s8 = scalar_lea.sflag [#allocation3], %s390_s6 }
 0x10b   : > { %p485_p3 = pnand %p488_p2, %p696_p8 }
 0x10d   : > { %597 = dma.done.wait (!%p485_p3), %s391_s8, 1024  }
 0x10e   : > { %599 = vsyncadd (!%p485_p3), %s391_s8, 4294966272  ;;  %s16_s17 = sadd.s32 1, %s622_s17   ;;  %s798_s12 = smov %s606_s13 }
 0x10f   : > { %p13_p5 = scmp.ge.s32.totalorder %s16_s17, 4   ;;  %s799_s13 = smov %s610_s14 }
 0x110   : > { %s800_s14 = smov %s702_s25  ;;  %s801_s15 = smov %s618_s16 }
 0x111   : > { %s802_s16 = smov %s804_s20  ;;  %15 = sbr.rel (!%p13_p5) target bundleno = 4 (0x4), region = 67 }
 0x118   :  { %396 = vsyncpa [#allocation3], 1 }
 0x119   :  { %398 = vsyncpa [#allocation3 + $0x1], 1 }

</bundles_post_ra>
